<compile_context>
chip_gen: v7x
topology: tpu7x:2x2x1
jax: 0.10.0
libtpu: 0.0.40
codegen_flags: <defaults>
</compile_context>

<pallas_src>
import functools
import math

import jax
import jax.numpy as jnp
from jax.experimental import pallas as pl
from jax.experimental.pallas import tpu as pltpu


_TARGET_BLOCK_BYTES = 4 * 1024 * 1024  # ~4 MiB per x block (double-buffered)


def _channel_gate_pool_kernel(w_ref, x_ref, o_ref, sum_acc, ssq_acc, *, hw, hw_tile):
    """Streaming avg/std pooling + weighted combine for one (row_tile, hw_tile) block."""
    t = pl.program_id(1)

    @pl.when(t == 0)
    def _init():
        sum_acc[...] = jnp.zeros_like(sum_acc)
        ssq_acc[...] = jnp.zeros_like(ssq_acc)

    x = x_ref[...].astype(jnp.float32)                       # (row_tile, hw_tile)
    if hw % hw_tile != 0:
        # Mask out-of-range spatial positions of the partial last HW tile.
        pos = t * hw_tile + jax.lax.broadcasted_iota(jnp.int32, x.shape, 1)
        x = jnp.where(pos < hw, x, 0.0)

    # Fused single pass: sum and sum-of-squares (VPU adds + one lane reduce each).
    sum_acc[...] += jnp.sum(x, axis=-1, keepdims=True)       # (row_tile, 1)
    ssq_acc[...] += jnp.sum(x * x, axis=-1, keepdims=True)   # (row_tile, 1)

    @pl.when(t == pl.num_programs(1) - 1)
    def _finalize():
        s = sum_acc[...]
        mean = s * jnp.float32(1.0 / hw)
        # One-pass unbiased variance; clamp tiny negatives from cancellation.
        # TODO(synk): torch returns NaN for HW == 1 (unbiased std undefined);
        # here std = 0 for that degenerate case instead.
        denom = jnp.float32(max(hw - 1, 1))
        var = jnp.maximum(ssq_acc[...] - s * mean, 0.0) / denom
        std = jnp.sqrt(var)
        w0 = w_ref[0]                                        # sigmoid(weight[0])
        w1 = w_ref[1]                                        # sigmoid(weight[1])
        o_ref[...] = 0.5 * (mean + std) + w0 * mean + w1 * std


def _pick_tiles(BC, HW, itemsize, hw_tile=None):
    # Lane (HW) tile: full extent when modest, else a large multiple of 128.
    if hw_tile is None:
        if HW <= 1024 or 8 * HW * itemsize <= _TARGET_BLOCK_BYTES:
            hw_tile = HW                                     # full extent: always legal
        else:
            hw_tile = max(512, (_TARGET_BLOCK_BYTES // (8 * itemsize)) // 128 * 128)

    # Sublane (row) tile: as many rows as fit in the byte target; multiple of 8
    # (a partial trailing row block is harmless) or the full row extent.
    max_rows = max(8, (_TARGET_BLOCK_BYTES // max(hw_tile * itemsize, 1)) // 8 * 8)
    row_tile = BC if BC <= max_rows else max_rows
    # Keep >= 2 row blocks on the "parallel" axis when there is enough work so
    # both v7x TensorCores (megacore) get a share.
    if row_tile == BC and BC >= 16:
        row_tile = max(8, (BC // 2) // 8 * 8)
    return row_tile, hw_tile


def channel_gate(x, gate_weight, conv_weight, *, hw_tile=None):
    """x: (B, C, H, W) -> attention scale (B, C, 1, 1), matching ChannelGate.forward."""
    B, C, H, W = x.shape
    HW = H * W
    BC = B * C
    x_rows = x.reshape(BC, HW)                               # metadata-only reshape of NCHW
    w_sig = jax.nn.sigmoid(gate_weight.astype(jnp.float32))

    row_tile, hw_tile = _pick_tiles(BC, HW, x_rows.dtype.itemsize, hw_tile)
    grid = (pl.cdiv(BC, row_tile), pl.cdiv(HW, hw_tile))

    kernel = functools.partial(_channel_gate_pool_kernel, hw=HW, hw_tile=hw_tile)
    pooled = pl.pallas_call(
        kernel,
        out_shape=jax.ShapeDtypeStruct((BC, 1), jnp.float32),
        grid=grid,
        in_specs=[
            pl.BlockSpec(memory_space=pltpu.MemorySpace.SMEM),          # sigmoid(gate w), (2,)
            pl.BlockSpec((row_tile, hw_tile), lambda r, t: (r, t)),     # x tile
        ],
        out_specs=pl.BlockSpec((row_tile, 1), lambda r, t: (r, 0)),
        scratch_shapes=[
            pltpu.VMEM((row_tile, 1), jnp.float32),          # running sum
            pltpu.VMEM((row_tile, 1), jnp.float32),          # running sum of squares
        ],
        compiler_params=pltpu.CompilerParams(
            dimension_semantics=("parallel", "arbitrary")),
    )(w_sig, x_rows)

    pooled = pooled.reshape(B, C)

    # Tiny 3-tap conv along C + final sigmoid on the (B, C) pooled result
    # (negligible work; kept in plain JAX).
    cw = conv_weight.reshape(-1).astype(jnp.float32)
    padded = jnp.pad(pooled, ((0, 0), (1, 1)))
    y = (cw[0] * padded[:, :C]
         + cw[1] * padded[:, 1:C + 1]
         + cw[2] * padded[:, 2:C + 2])
    return jax.nn.sigmoid(y).astype(x.dtype).reshape(B, C, 1, 1)


def ref_channel_gate(x, gate_weight, conv_weight):
    """Pure-JAX reference mirroring the PyTorch forward."""
    B, C, H, W = x.shape
    xf = x.reshape(B, C, -1).astype(jnp.float32)
    avg = xf.mean(axis=-1)
    std = jnp.std(xf, axis=-1, ddof=1)
    w = jax.nn.sigmoid(gate_weight.astype(jnp.float32))
    out = 0.5 * (avg + std) + w[0] * avg + w[1] * std
    cw = conv_weight.reshape(-1).astype(jnp.float32)
    padded = jnp.pad(out, ((0, 0), (1, 1)))
    y = (cw[0] * padded[:, :C]
         + cw[1] * padded[:, 1:C + 1]
         + cw[2] * padded[:, 2:C + 2])
    return jax.nn.sigmoid(y).astype(x.dtype).reshape(B, C, 1, 1)


if __name__ == "__main__":
    key = jax.random.PRNGKey(0)
    kx, kg, kc = jax.random.split(key, 3)

    B, C, H, W = 2, 4, 16, 16
    x = jax.random.normal(kx, (B, C, H, W), dtype=jnp.float32)

    # nn.Parameter(torch.rand(2)) -> uniform [0, 1)
    gate_weight = jax.random.uniform(kg, (2,), dtype=jnp.float32)
    # Conv2d(1, 1, (1, 3), bias=False) weight -> uniform in +/- 1/sqrt(fan_in)
    bound = 1.0 / math.sqrt(3.0)
    conv_weight = jax.random.uniform(kc, (3,), minval=-bound, maxval=bound,
                                     dtype=jnp.float32)

    scale = jax.block_until_ready(channel_gate(x, gate_weight, conv_weight))
    ref = ref_channel_gate(x, gate_weight, conv_weight)
    assert scale.shape == (B, C, 1, 1)
    assert jnp.allclose(scale, ref, atol=2e-5, rtol=2e-5)

    # Tiled-HW + masked partial last tile: HW = 300 with an explicit 128 tile.
    x2 = jax.random.normal(jax.random.PRNGKey(1), (2, 4, 15, 20), dtype=jnp.float32)
    scale2 = jax.block_until_ready(
        channel_gate(x2, gate_weight, conv_weight, hw_tile=128))
    ref2 = ref_channel_gate(x2, gate_weight, conv_weight)
    assert jnp.allclose(scale2, ref2, atol=2e-5, rtol=2e-5)

    # Multiple row blocks + partial trailing row block + bf16 input (cast in-kernel).
    x3 = jax.random.normal(jax.random.PRNGKey(2), (4, 5, 8, 8), dtype=jnp.bfloat16)
    scale3 = jax.block_until_ready(channel_gate(x3, gate_weight, conv_weight))
    ref3 = ref_channel_gate(x3, gate_weight, conv_weight)
    assert jnp.allclose(scale3.astype(jnp.float32), ref3.astype(jnp.float32),
                        atol=1e-2, rtol=1e-2)

    print("KERNEL_OK")
</pallas_src>

<mosaic_0001>
module attributes {stable_mosaic.version = 11 : i64} {
  func.func @_channel_gate_pool_kernel(%arg0: i32, %arg1: i32, %arg2: memref<2xf32, #tpu.memory_space<smem>>, %arg3: memref<8x256xf32, #tpu.memory_space<vmem>>, %arg4: memref<8x1xf32, #tpu.memory_space<vmem>>, %arg5: memref<8x1xf32, #tpu.memory_space<vmem>>, %arg6: memref<8x1xf32, #tpu.memory_space<vmem>>) attributes {dimension_semantics = [#tpu.dimension_semantics<parallel>, #tpu.dimension_semantics<arbitrary>], iteration_bounds = array<i64: 1, 1>, scalar_prefetch = 0 : i64, scratch_operands = 2 : i64, tpu.core_type = #tpu.core_type<tc>, window_params = [{transform_indices = @transform_0, window_bounds = array<i64: 2>}, {transform_indices = @transform_1, window_bounds = array<i64: 8, 256>}, {transform_indices = @transform_2, window_bounds = array<i64: 8, 1>}]} {
    %c0_i32 = arith.constant 0 : i32
    %0 = arith.cmpi eq, %arg1, %c0_i32 : i32
    %1 = arith.extui %0 : i1 to i32
    %c0_i32_0 = arith.constant 0 : i32
    %2 = arith.cmpi ne, %1, %c0_i32_0 : i32
    scf.if %2 {
      %cst_13 = arith.constant 0.000000e+00 : f32
      %18 = vector.broadcast %cst_13 : f32 to vector<8x1xf32>
      %c0_14 = arith.constant 0 : index
      %c0_15 = arith.constant 0 : index
      %19 = vector.load %arg5[%c0_14, %c0_15] : memref<8x1xf32, #tpu.memory_space<vmem>>, vector<8x1xf32>
      tpu.vector_store %arg5[%c0_14, %c0_15], %18 {strides = array<i32>} : memref<8x1xf32, #tpu.memory_space<vmem>>, vector<8x1xf32>,
      %cst_16 = arith.constant 0.000000e+00 : f32
      %20 = vector.broadcast %cst_16 : f32 to vector<8x1xf32>
      %c0_17 = arith.constant 0 : index
      %c0_18 = arith.constant 0 : index
      %21 = vector.load %arg6[%c0_17, %c0_18] : memref<8x1xf32, #tpu.memory_space<vmem>>, vector<8x1xf32>
      tpu.vector_store %arg6[%c0_17, %c0_18], %20 {strides = array<i32>} : memref<8x1xf32, #tpu.memory_space<vmem>>, vector<8x1xf32>,
    } else {
    }
    %c0 = arith.constant 0 : index
    %c0_1 = arith.constant 0 : index
    %3 = vector.load %arg3[%c0, %c0_1] : memref<8x256xf32, #tpu.memory_space<vmem>>, vector<8x256xf32>
    %c0_2 = arith.constant 0 : index
    %c0_3 = arith.constant 0 : index
    %4 = vector.load %arg5[%c0_2, %c0_3] : memref<8x1xf32, #tpu.memory_space<vmem>>, vector<8x1xf32>
    %cst = arith.constant dense<0.000000e+00> : vector<8xf32>
    %5 = vector.multi_reduction <add>, %3, %cst [1] : vector<8x256xf32> to vector<8xf32>
    %6 = vector.shape_cast %5 : vector<8xf32> to vector<8x1xf32>
    %7 = arith.addf %4, %6 : vector<8x1xf32>
    %c0_4 = arith.constant 0 : index
    %c0_5 = arith.constant 0 : index
    %8 = vector.load %arg5[%c0_4, %c0_5] : memref<8x1xf32, #tpu.memory_space<vmem>>, vector<8x1xf32>
    tpu.vector_store %arg5[%c0_4, %c0_5], %7 {strides = array<i32>} : memref<8x1xf32, #tpu.memory_space<vmem>>, vector<8x1xf32>,
    %c0_6 = arith.constant 0 : index
    %c0_7 = arith.constant 0 : index
    %9 = vector.load %arg6[%c0_6, %c0_7] : memref<8x1xf32, #tpu.memory_space<vmem>>, vector<8x1xf32>
    %10 = arith.mulf %3, %3 : vector<8x256xf32>
    %cst_8 = arith.constant dense<0.000000e+00> : vector<8xf32>
    %11 = vector.multi_reduction <add>, %10, %cst_8 [1] : vector<8x256xf32> to vector<8xf32>
    %12 = vector.shape_cast %11 : vector<8xf32> to vector<8x1xf32>
    %13 = arith.addf %9, %12 : vector<8x1xf32>
    %c0_9 = arith.constant 0 : index
    %c0_10 = arith.constant 0 : index
    %14 = vector.load %arg6[%c0_9, %c0_10] : memref<8x1xf32, #tpu.memory_space<vmem>>, vector<8x1xf32>
    tpu.vector_store %arg6[%c0_9, %c0_10], %13 {strides = array<i32>} : memref<8x1xf32, #tpu.memory_space<vmem>>, vector<8x1xf32>,
    %c0_i32_11 = arith.constant 0 : i32
    %15 = arith.cmpi eq, %arg1, %c0_i32_11 : i32
    %16 = arith.extui %15 : i1 to i32
    %c0_i32_12 = arith.constant 0 : i32
    %17 = arith.cmpi ne, %16, %c0_i32_12 : i32
    scf.if %17 {
      %c0_13 = arith.constant 0 : index
      %c0_14 = arith.constant 0 : index
      %18 = vector.load %arg5[%c0_13, %c0_14] : memref<8x1xf32, #tpu.memory_space<vmem>>, vector<8x1xf32>
      %cst_15 = arith.constant 3.906250e-03 : f32
      %19 = vector.broadcast %cst_15 : f32 to vector<8x1xf32>
      %20 = arith.mulf %18, %19 : vector<8x1xf32>
      %c0_16 = arith.constant 0 : index
      %c0_17 = arith.constant 0 : index
      %21 = vector.load %arg6[%c0_16, %c0_17] : memref<8x1xf32, #tpu.memory_space<vmem>>, vector<8x1xf32>
      %22 = arith.mulf %18, %20 : vector<8x1xf32>
      %23 = arith.subf %21, %22 : vector<8x1xf32>
      %cst_18 = arith.constant 0.000000e+00 : f32
      %24 = vector.broadcast %cst_18 : f32 to vector<8x1xf32>
      %25 = arith.maximumf %23, %24 : vector<8x1xf32>
      %cst_19 = arith.constant 2.550000e+02 : f32
      %26 = vector.broadcast %cst_19 : f32 to vector<8x1xf32>
      %27 = arith.divf %25, %26 : vector<8x1xf32>
      %28 = math.sqrt %27 : vector<8x1xf32>
      %c0_20 = arith.constant 0 : index
      %29 = memref.load %arg2[%c0_20] : memref<2xf32, #tpu.memory_space<smem>>
      %c1 = arith.constant 1 : index
      %30 = memref.load %arg2[%c1] : memref<2xf32, #tpu.memory_space<smem>>
      %31 = arith.addf %20, %28 : vector<8x1xf32>
      %cst_21 = arith.constant 5.000000e-01 : f32
      %32 = vector.broadcast %cst_21 : f32 to vector<8x1xf32>
      %33 = arith.mulf %32, %31 : vector<8x1xf32>
      %34 = vector.broadcast %29 : f32 to vector<8x1xf32>
      %35 = arith.mulf %34, %20 : vector<8x1xf32>
      %36 = arith.addf %33, %35 : vector<8x1xf32>
      %37 = vector.broadcast %30 : f32 to vector<8x1xf32>
      %38 = arith.mulf %37, %28 : vector<8x1xf32>
      %39 = arith.addf %36, %38 : vector<8x1xf32>
      %c0_22 = arith.constant 0 : index
      %c0_23 = arith.constant 0 : index
      %40 = vector.load %arg4[%c0_22, %c0_23] : memref<8x1xf32, #tpu.memory_space<vmem>>, vector<8x1xf32>
      tpu.vector_store %arg4[%c0_22, %c0_23], %39 {strides = array<i32>} : memref<8x1xf32, #tpu.memory_space<vmem>>, vector<8x1xf32>,
    } else {
    }
    return
  }
  func.func @transform_0(%arg0: i32, %arg1: i32) -> i32 {
    %c0_i32 = arith.constant 0 : i32
    %c0_i32_0 = arith.constant 0 : i32
    return %c0_i32 : i32
  }
  func.func @transform_1(%arg0: i32, %arg1: i32) -> (i32, i32) {
    %c0_i32 = arith.constant 0 : i32
    return %arg0, %arg1 : i32, i32
  }
  func.func @transform_2(%arg0: i32, %arg1: i32) -> (i32, i32) {
    %c0_i32 = arith.constant 0 : i32
    %c0_i32_0 = arith.constant 0 : i32
    return %arg0, %c0_i32 : i32, i32
  }
}

</mosaic_0001>

<bundles_post_ra>
// kernel: tpu_custom_call.1
= control target key start
LH: loop header
LB: loop body
LE: loop exit
PB: predicated region body
PF: predicated region fallthrough
CT: control target
= control target key end

     0   :  { %7 = vsyncpa [#allocation6], 0  ;;  %s185_s0 = inlined_call_operand.hbm [shape: f32[2], index: 0, kind: input, shape index: {}]   ;;  %s186_s1 = inlined_call_operand.hbm [shape: f32[8,256], index: 1, kind: input, shape index: {}]   ;;  %s187_s2 = inlined_call_operand.vmem [shape: f32[8,1], index: 2, kind: output, shape index: {}]  }
   0x1   :  { %8 = vsyncpa [#allocation5], 0  ;;  %s99_s11 = scalar_lea.hbm %s185_s0, 16 }
   0x2   :  { %p100_p0 = scmp.ne.s32.totalorder %s185_s0, %s99_s11  ;;  %p103_p1 = scmp.lt.u32.totalorder %s99_s11, %s185_s0 }
   0x4   :  { %p105_p2 = pnand %p103_p1, %p100_p0 }
   0x6   :  { %108 = shalt.err (!%p105_p2)
}
   0x7   :  { %s135_s16 = smov [#allocation4]   ;;  %s136_s19 = smov [#allocation7]  }
   0x8   :  { %16 = dma.hbm_to_smem %s185_s0, 16, %s135_s16, [#allocation6]  }
   0x9   :  { %s23_s20 = sshll.u32 %s136_s19, 4  ;;  %s109_s23 = scalar_lea.hbm %s186_s1, 256  ;;  %s24_s20 = int_to_ptr.vmem [resolvable:$true] %s23_s20 }
   0xa   :  { %p110_p3 = scmp.ne.s32.totalorder %s186_s1, %s109_s23  ;;  %p113_p4 = scmp.lt.u32.totalorder %s109_s23, %s186_s1 }
   0xc   :  { %p115_p5 = pnand %p113_p4, %p110_p3 }
   0xe   :  { %118 = shalt.err (!%p115_p5)
}
   0xf   :  { %s119_s28 = scalar_lea.vmem %s24_s20, 256  ;;  %p124_p7 = scmp.lt.s32.totalorder %s24_s20, %s24_s20 }
  0x10   :  { %p120_p6 = scmp.ne.s32.totalorder %s24_s20, %s119_s28  ;;  %p125_p8 = scmp.lt.s32.totalorder %s119_s28, %s119_s28 }
  0x12   :  { %p126_p9 = por %p125_p8, %p124_p7 }
  0x14   :  { %p127_p10 = pnand %p126_p9, %p120_p6 }
  0x16   :  { %130 = shalt.err (!%p127_p10)
}
  0x17   :  { %26 = dma.hbm_to_vmem [thread:$0]  %s186_s1, 256, %s24_s20, [#allocation5]  }
  0x18   :  { %131 = dma.done.wait [#allocation6], 16  }
  0x19   :  { %132 = vsyncadd [#allocation6], 4294967280 }
  0x1a   :  { %133 = dma.done.wait [#allocation5], 256  }
  0x1b   :  { %134 = vsyncadd [#allocation5], 4294967040 }
  0x1c   :  { %33 = sfence }
  0x1d   :  { %v41_v0 = vld [vmem:[#allocation7] sm:$0xff]  ;;  %v42_v1 = vld [vmem:[#allocation7 + $0x8] sm:$0xff]  ;;  %vm38_vm0 = vcmask 7168   ;;  %v137_v6 = vmov 0.0   ;;  %s76_s1 = sld [smem:[#allocation4]]  ;;  %s93_s30 = sld [smem:[#allocation4 + $0x1]] }
  0x1e   :  { %v44_v2 = vadd.f32 %v42_v1, %v41_v0  ;;  %v51_v3 = vmul.f32 %v41_v0, %v41_v0  ;;  %v52_v4 = vmul.f32 %v42_v1, %v42_v1  ;;  %39 = vst.msk [vmem:[#allocation2] sm:$0xff] %vm38_vm0, %v137_v6  ;;  %40 = vst.msk [vmem:[#allocation3] sm:$0xff] %vm38_vm0, %v137_v6 }
  0x20   :  { %45 = vadd.xlane.f32.xlu0 %v44_v2  ;;  %v53_v5 = vadd.f32 %v52_v4, %v51_v3 }
  0x23   :  { %v80_v24 = vstv %s76_s1  ;;  %v83_v27 = vstv %s93_s30 }
  0x24   :  { %54 = vadd.xlane.f32.xlu0 %v53_v5 }
  0x25   :  { %v43_v7 = vld [vmem:[#allocation2] sm:$0xff]  ;;  %v50_v10 = vld [vmem:[#allocation3] sm:$0xff] }
  0xad   :  { %v46_v8 = vpop.xlane.xlu0 %45 }
  0xae   :  { %v47_v9 = vadd.f32 %v46_v8, %v43_v7 }
  0xb0   :  { %49 = vst.msk [vmem:[#allocation2] sm:$0xff] %vm38_vm0, %v47_v9 }
  0xb1   :  { %v55_v11 = vpop.xlane.xlu0 %54 }
  0xb2   :  { %v56_v12 = vadd.f32 %v55_v11, %v50_v10 }
  0xb4   :  { %57 = vst.msk [vmem:[#allocation3] sm:$0xff] %vm38_vm0, %v56_v12 }
  0xb7   :  { %v61_v13 = vld [vmem:[#allocation2] sm:$0xff] }
  0xb8   :  { %v62_v14 = vmul.f32 0.00390625, %v61_v13 }
  0xba   :  { %v64_v15 = vmul.f32 %v62_v14, %v61_v13  ;;  %v81_v28 = vmul.f32 %v80_v24, %v62_v14 }
  0xbb   :  { %v63_v16 = vld [vmem:[#allocation3] sm:$0xff] }
  0xbc   :  { %v65_v17 = vsub.f32 %v63_v16, %v64_v15 }
  0xbe   :  { %v66_v18 = vmax.f32 %v65_v17, 0.0 }
  0xc0   :  { %v68_v19 = vmul.f32 0.003921569, %v66_v18 }
  0xc2   :  { %97 = vrsqrt.f32 %v68_v19  ;;  %vm71_vm1 = vcmp.eq.f32.partialorder %v68_v19, inf  ;;  %v74_v22 = vand.u32 2147483648, %v68_v19  ;;  %vm73_vm2 = vcmp.eq.f32.partialorder %v68_v19, 0.0 }
  0xcc   :  { %v98_v20 = vpop.eup %97 }
  0xcd   :  { %v70_v21 = vmul.f32 %v98_v20, %v68_v19 }
  0xcf   :  { %v72_v23 = vsel %vm71_vm1, %v68_v19, %v70_v21 }
  0xd0   :  { %v75_v25 = vsel %vm73_vm2, %v74_v22, %v72_v23 }
  0xd1   :  { %v78_v26 = vadd.f32 %v75_v25, %v62_v14  ;;  %v84_v31 = vmul.f32 %v83_v27, %v75_v25 }
  0xd3   :  { %v79_v29 = vmul.f32 0.5, %v78_v26 }
  0xd5   :  { %v82_v30 = vadd.f32 %v81_v28, %v79_v29 }
  0xd7   :  { %v85_v32 = vadd.f32 %v84_v31, %v82_v30 }
  0xd9   :  { %86 = vst.msk [vmem:[%s187_s2] sm:$0xff] %vm38_vm0, %v85_v32 }
  0xda   :  { %91 = vsyncpa [#allocation5], 1 }
  0xdb   :  { %92 = vsyncpa [#allocation6], 1 }

</bundles_post_ra>
